<compile_context>
chip_gen: v7x
topology: tpu7x:2x2x1
jax: 0.10.0
libtpu: 0.0.40
codegen_flags: <defaults>
</compile_context>

<pallas_src>
import math

import jax
import jax.numpy as jnp
from jax.experimental import pallas as pl
from jax.experimental.pallas import tpu as pltpu


def _layer_scale_kernel(gamma_ref, x_ref, o_ref):
    # gamma_ref: (1, D) tile, resident across the whole grid (index_map -> (0, 0))
    # x_ref / o_ref: (tile_rows, D) tile of the flattened (R, D) input
    o_ref[...] = x_ref[...] * gamma_ref[...]


def _pick_tile_rows(rows: int, d_work: int, itemsize: int, sublane: int,
                    byte_budget: int) -> int:
    """Largest sublane-aligned row tile within the byte budget; prefer one that
    divides rows evenly so the final grid step is not a masked partial tile."""
    max_tile = (byte_budget // (d_work * itemsize)) // sublane * sublane
    max_tile = max(sublane, max_tile)
    if rows <= max_tile:
        return rows
    if rows % sublane == 0:
        # Bounded downward search (<=128 candidates) for an even divisor.
        t = max_tile
        lo = max(sublane, max_tile - 128 * sublane, max_tile // 2)
        while t >= lo:
            if rows % t == 0:
                return t
            t -= sublane
    return max_tile


def layer_scale(
    x: jax.Array,
    gamma: jax.Array,
    *,
    tile_byte_budget: int = 6 * 1024 * 1024,
) -> jax.Array:
    """y = x * gamma  (gamma broadcast over all leading dims of x)."""
    orig_shape = x.shape
    dim = gamma.shape[0]
    assert x.shape[-1] == dim, "last dim of x must equal gamma dim"

    # Keep the multiply single-precision-path: gamma computed in x's dtype
    # (matches PyTorch's result dtype; avoids up/downcast chains on v5e).
    gamma = gamma.astype(x.dtype)

    # Flatten leading dims -> (R, D); kernel tiles the row axis.
    x2d = x.reshape(-1, dim)
    rows = x2d.shape[0]

    # Lane-dense repacking: if D is not a multiple of 128, fold k rows into one
    # lane-dense row of width k*D (multiple of 128) so stores are unmasked.
    d_work = dim
    gamma_work = gamma
    packed = False
    if dim % 128 != 0:
        k = 128 // math.gcd(dim, 128)
        if rows % k == 0:
            packed = True
            d_work = dim * k
            rows = rows // k
            x2d = x2d.reshape(rows, d_work)
            gamma_work = jnp.tile(gamma, k)
        # else: fall back to the unpacked layout (masked partial stores).

    itemsize = jnp.dtype(x.dtype).itemsize
    sublane = max(8, 32 // itemsize)  # 8 for f32, 16 for bf16, 32 for int8/fp8

    tile_rows = _pick_tile_rows(rows, d_work, itemsize, sublane, tile_byte_budget)
    grid = (pl.cdiv(rows, tile_rows),)

    gamma2d = gamma_work.reshape(1, d_work)

    # Scoped VMEM: double-buffered input + output tiles (4 x tile) + gamma.
    # With a 6 MiB tile budget this is ~26 MiB — inside v7x's 64 MiB physical
    # and above v5e's 16 MiB scoped default.
    tile_bytes = tile_rows * d_work * itemsize
    gamma_bytes = d_work * itemsize
    vmem_needed = 4 * tile_bytes + 2 * gamma_bytes + (1 << 20)
    vmem_limit = int(min(48 * 1024 * 1024, max(16 * 1024 * 1024, vmem_needed)))

    total_elems = rows * d_work
    total_bytes = total_elems * itemsize
    cost = pl.CostEstimate(
        flops=total_elems,                      # one multiply per element
        transcendentals=0,
        bytes_accessed=2 * total_bytes + gamma_bytes,
    )

    out2d = pl.pallas_call(
        _layer_scale_kernel,
        out_shape=jax.ShapeDtypeStruct((rows, d_work), x.dtype),
        grid_spec=pltpu.PrefetchScalarGridSpec(
            num_scalar_prefetch=0,
            grid=grid,
            in_specs=[
                pl.BlockSpec((1, d_work), lambda i: (0, 0)),            # gamma (resident)
                pl.BlockSpec((tile_rows, d_work), lambda i: (i, 0)),    # x tile
            ],
            out_specs=pl.BlockSpec((tile_rows, d_work), lambda i: (i, 0)),
        ),
        compiler_params=pltpu.CompilerParams(
            dimension_semantics=("parallel",),   # megacore / v7x 2-TC sharding
            vmem_limit_bytes=vmem_limit,
        ),
        cost_estimate=cost,
    )(gamma2d, x2d)

    if packed:
        out2d = out2d.reshape(-1, dim)
    return out2d.reshape(orig_shape)


if __name__ == "__main__":
    key = jax.random.PRNGKey(0)
    init_values = 1e-5

    # Small shapes consistent with a ViT block input: (batch, seq, dim).
    B, N, D = 2, 8, 32
    x = jax.random.normal(key, (B, N, D), dtype=jnp.float32)
    # Deterministic parameter init matching nn.Parameter(init_values * torch.ones(dim))
    gamma = init_values * jnp.ones((D,), dtype=jnp.float32)

    y = jax.block_until_ready(layer_scale(x, gamma))
    y_ref = x * gamma
    assert jnp.allclose(y, y_ref, atol=1e-6, rtol=1e-6), "mismatch vs reference (packed path)"

    # Also exercise the unpacked fallback path (rows not divisible by the
    # lane-packing factor) to make sure both layouts are correct.
    B2, N2 = 3, 5
    x2 = jax.random.normal(jax.random.PRNGKey(1), (B2, N2, D), dtype=jnp.float32)
    y2 = jax.block_until_ready(layer_scale(x2, gamma))
    y2_ref = x2 * gamma
    assert jnp.allclose(y2, y2_ref, atol=1e-6, rtol=1e-6), "mismatch vs reference (fallback path)"

    # Larger lane-dense shape (D multiple of 128) with many row tiles to hit
    # the steady-state pipelined path, in bf16.
    B3, N3, D3 = 4, 1024, 384
    x3 = jax.random.normal(jax.random.PRNGKey(2), (B3, N3, D3), dtype=jnp.bfloat16)
    g3 = init_values * jnp.ones((D3,), dtype=jnp.float32)
    y3 = jax.block_until_ready(layer_scale(x3, g3))
    y3_ref = x3 * g3.astype(jnp.bfloat16)
    assert jnp.allclose(
        y3.astype(jnp.float32), y3_ref.astype(jnp.float32), atol=1e-3, rtol=1e-2
    ), "mismatch vs reference (large bf16 path)"

    print("KERNEL_OK")
</pallas_src>

<mosaic_0001>
module attributes {stable_mosaic.version = 11 : i64} {
  func.func @_layer_scale_kernel(%arg0: i32, %arg1: memref<1x128xf32, #tpu.memory_space<vmem>>, %arg2: memref<4x128xf32, #tpu.memory_space<vmem>>, %arg3: memref<4x128xf32, #tpu.memory_space<vmem>>) attributes {dimension_semantics = [#tpu.dimension_semantics<parallel>], iteration_bounds = array<i64: 1>, scalar_prefetch = 0 : i64, scratch_operands = 0 : i64, tpu.core_type = #tpu.core_type<tc>, window_params = [{pipeline_mode = #tpu.pipeline_mode<synchronous>, transform_indices = @transform_0, window_bounds = array<i64: 1, 128>}, {transform_indices = @transform_1, window_bounds = array<i64: 4, 128>}, {transform_indices = @transform_2, window_bounds = array<i64: 4, 128>}]} {
    %c0 = arith.constant 0 : index
    %c0_0 = arith.constant 0 : index
    %0 = vector.load %arg2[%c0, %c0_0] : memref<4x128xf32, #tpu.memory_space<vmem>>, vector<4x128xf32>
    %c0_1 = arith.constant 0 : index
    %c0_2 = arith.constant 0 : index
    %1 = vector.load %arg1[%c0_1, %c0_2] : memref<1x128xf32, #tpu.memory_space<vmem>>, vector<1x128xf32>
    %2 = vector.broadcast %1 : vector<1x128xf32> to vector<4x128xf32>
    %3 = arith.mulf %0, %2 : vector<4x128xf32>
    %c0_3 = arith.constant 0 : index
    %c0_4 = arith.constant 0 : index
    %4 = vector.load %arg3[%c0_3, %c0_4] : memref<4x128xf32, #tpu.memory_space<vmem>>, vector<4x128xf32>
    tpu.vector_store %arg3[%c0_3, %c0_4], %3 {strides = array<i32>} : memref<4x128xf32, #tpu.memory_space<vmem>>, vector<4x128xf32>,
    return
  }
  func.func @transform_0(%arg0: i32) -> (i32, i32) {
    %c0_i32 = arith.constant 0 : i32
    %c0_i32_0 = arith.constant 0 : i32
    %c0_i32_1 = arith.constant 0 : i32
    return %c0_i32, %c0_i32_0 : i32, i32
  }
  func.func @transform_1(%arg0: i32) -> (i32, i32) {
    %c0_i32 = arith.constant 0 : i32
    %c0_i32_0 = arith.constant 0 : i32
    return %arg0, %c0_i32 : i32, i32
  }
  func.func @transform_2(%arg0: i32) -> (i32, i32) {
    %c0_i32 = arith.constant 0 : i32
    %c0_i32_0 = arith.constant 0 : i32
    return %arg0, %c0_i32 : i32, i32
  }
}

</mosaic_0001>

<bundles_post_ra>
// kernel: tpu_custom_call.1
= control target key start
LH: loop header
LB: loop body
LE: loop exit
PB: predicated region body
PF: predicated region fallthrough
CT: control target
= control target key end

     0   :  { %7 = vsyncpa [#allocation3], 0  ;;  %s192_s0 = inlined_call_operand.hbm [shape: f32[1,128], index: 0, kind: input, shape index: {}]   ;;  %s193_s1 = inlined_call_operand.hbm [shape: f32[4,128], index: 1, kind: input, shape index: {}]   ;;  %s194_s2 = inlined_call_operand.hbm [shape: f32[4,128], index: 2, kind: output, shape index: {}]  }
   0x1   :  { %8 = vsyncpa [#allocation6], 0 }
   0x2   :  { %9 = vsyncpa [#allocation4], 0  ;;  %s138_s9 = smov [#allocation2]   ;;  %s139_s11 = smov [#allocation5]  }
   0x3   :  { %s16_s10 = sshll.u32 %s138_s9, 4  ;;  %s26_s12 = sshll.u32 %s139_s11, 4  ;;  %s17_s10 = int_to_ptr.vmem [resolvable:$true] %s16_s10  ;;  %s27_s12 = int_to_ptr.vmem [resolvable:$true] %s26_s12 }
   0x4   :  { %s66_s15 = scalar_lea.hbm %s192_s0, 16 }
   0x5   :  { %p67_p0 = scmp.ne.s32.totalorder %s192_s0, %s66_s15  ;;  %p70_p1 = scmp.lt.u32.totalorder %s66_s15, %s192_s0 }
   0x7   :  { %p72_p2 = pnand %p70_p1, %p67_p0 }
   0x9   :  { %75 = shalt.err (!%p72_p2)
}
   0xa   :  { %s76_s20 = scalar_lea.vmem %s17_s10, 16  ;;  %s80_s21 = scalar_lea.vmem %s17_s10, 32 }
   0xb   :  { %p77_p3 = scmp.ne.s32.totalorder %s17_s10, %s76_s20  ;;  %p81_p4 = scmp.lt.s32.totalorder %s17_s10, %s17_s10 }
   0xc   :  { %p82_p5 = scmp.lt.s32.totalorder %s80_s21, %s76_s20 }
   0xe   :  { %p83_p6 = por %p82_p5, %p81_p4 }
  0x10   :  { %p84_p7 = pnand %p83_p6, %p77_p3 }
  0x12   :  { %87 = shalt.err (!%p84_p7)
}
  0x13   :  { %19 = dma.hbm_to_vmem [thread:$0]  %s192_s0, 16, %s17_s10, [#allocation3]  }
  0x14   :  { %s88_s26 = scalar_lea.hbm %s193_s1, 64 }
  0x15   :  { %p89_p8 = scmp.ne.s32.totalorder %s193_s1, %s88_s26  ;;  %p92_p9 = scmp.lt.u32.totalorder %s88_s26, %s193_s1 }
  0x17   :  { %p94_p10 = pnand %p92_p9, %p89_p8 }
  0x19   :  { %97 = shalt.err (!%p94_p10)
}
  0x1a   :  { %s98_s3 = scalar_lea.vmem %s27_s12, 64  ;;  %p103_p12 = scmp.lt.s32.totalorder %s27_s12, %s27_s12 }
  0x1b   :  { %p99_p11 = scmp.ne.s32.totalorder %s27_s12, %s98_s3  ;;  %p104_p13 = scmp.lt.s32.totalorder %s98_s3, %s98_s3 }
  0x1d   :  { %p105_p0 = por %p104_p13, %p103_p12 }
  0x1f   :  { %p106_p1 = pnand %p105_p0, %p99_p11 }
  0x21   :  { %109 = shalt.err (!%p106_p1)
}
  0x22   :  { %29 = dma.hbm_to_vmem [thread:$0]  %s193_s1, 64, %s27_s12, [#allocation6]  }
  0x23   :  { %132 = dma.done.wait [#allocation3], 16  }
  0x24   :  { %133 = vsyncadd [#allocation3], 4294967280 }
  0x25   :  { %134 = dma.done.wait [#allocation6], 64  }
  0x26   :  { %135 = vsyncadd [#allocation6], 4294967232  ;;  %s140_s5 = smov [#allocation7]   ;;  %v36_v0 = vld [vmem:[#allocation5] sm:$0xf] }
  0x27   :  { %s52_s6 = sshll.u32 %s140_s5, 4  ;;  %v62_v1 = vld [vmem:[#allocation2] ss:$0 sm:$0xff]  ;;  %s53_s6 = int_to_ptr.vmem [resolvable:$true] %s52_s6 }
  0x28   :  { %v44_v2 = vmul.f32 %v62_v1, %v36_v0  ;;  %s110_s7 = scalar_lea.vmem %s53_s6, 64  ;;  %p115_p3 = scmp.lt.s32.totalorder %s53_s6, %s53_s6 }
  0x29   :  { %p111_p2 = scmp.ne.s32.totalorder %s53_s6, %s110_s7  ;;  %p116_p4 = scmp.lt.s32.totalorder %s110_s7, %s110_s7 }
  0x2a   :  { %45 = vst [vmem:[#allocation7] sm:$0xf] %v44_v2 }
  0x2b   :  { %p117_p5 = por %p116_p4, %p115_p3 }
  0x2d   :  { %p118_p6 = pnand %p117_p5, %p111_p2 }
  0x2f   :  { %121 = shalt.err (!%p118_p6)
}
  0x30   :  { %s122_s9 = scalar_lea.hbm %s194_s2, 64 }
  0x31   :  { %p123_p7 = scmp.ne.s32.totalorder %s194_s2, %s122_s9  ;;  %p126_p8 = scmp.lt.u32.totalorder %s122_s9, %s194_s2 }
  0x33   :  { %p128_p9 = pnand %p126_p8, %p123_p7 }
  0x35   :  { %131 = shalt.err (!%p128_p9)
}
  0x36   :  { %55 = dma.vmem_to_hbm [thread:$0]  %s53_s6, 64, %s194_s2, [#allocation4]  }
  0x37   :  { %136 = dma.done.wait [#allocation4], 64  }
  0x38   :  { %137 = vsyncadd [#allocation4], 4294967232 }
  0x39   :  { %59 = vsyncpa [#allocation3], 1 }
  0x3a   :  { %60 = vsyncpa [#allocation6], 1 }
  0x3b   :  { %61 = vsyncpa [#allocation4], 1 }

</bundles_post_ra>
